<compile_context>
chip_gen: v7x
topology: tpu7x:2x2x1
jax: 0.10.0
libtpu: 0.0.40
codegen_flags: <defaults>
</compile_context>

<pallas_src>
import jax
import jax.numpy as jnp
from jax.experimental import pallas as pl
from jax.experimental.pallas import tpu as pltpu


def lstm_fc_kernel(x_ref, wrow_ref, bias_ref, whh_ref, wfc_ref, bfc_ref,
                   out_ref, hs_ref):
    """Whole forward pass in a single invocation.

    x_ref    : (S, 1)   f32   x for the last batch row (the only one the output uses)
    wrow_ref : (1, 4H)  f32   W_ih[:,0] packed in gate order [i,f,o,g]
    bias_ref : (1, 4H)  f32   b_ih + b_hh, same packing
    whh_ref  : (H, 4H)  bf16  W_hh^T packed in gate order [i,f,o,g]  (lane-dense)
    wfc_ref  : (H, P)   f32   W_fc^T
    bfc_ref  : (1, P)   f32   b_fc
    out_ref  : (S, P)   f32   fc(h_t) for every timestep t
    hs_ref   : (S, H)   f32   VMEM scratch collecting h_t
    """
    S = x_ref.shape[0]
    H = whh_ref.shape[0]
    G = whh_ref.shape[1]                       # 4H

    # In-kernel input projection (2 VPU ops, independent of the recurrence).
    gx = x_ref[...] * wrow_ref[...] + bias_ref[...]            # (S, 4H) f32

    # Hoisted out of the unrolled loop.
    whh = whh_ref[...]                                          # (H, 4H) bf16
    lane = jax.lax.broadcasted_iota(jnp.int32, (1, G), 1)
    sig_mask = lane < 3 * H                                     # [i|f|o] sigmoid, [g] tanh

    h = jnp.zeros((1, H), jnp.float32)
    c = jnp.zeros((1, H), jnp.float32)

    # TODO(synk): for large S, switch to lax.fori_loop(unroll=k) + a time-chunked
    # grid with h/c carried in scratch so gx/hs stay within VMEM (v5e 16MiB / v7x 64MiB).
    for t in range(S):                         # fully unrolled serial recurrence
        # ONE fused lane-dense gate matmul per step (bf16 operands, f32 accumulate).
        z = gx[t:t + 1, :] + jnp.dot(h.astype(whh.dtype), whh,
                                     preferred_element_type=jnp.float32)   # (1, 4H)
        # Packed nonlinearity: one sigmoid + one tanh over the full slab, 1 select.
        act = jnp.where(sig_mask, jax.nn.sigmoid(z), jnp.tanh(z))
        i_g = act[:, 0:H]
        f_g = act[:, H:2 * H]
        o_g = act[:, 2 * H:3 * H]
        g_g = act[:, 3 * H:4 * H]
        c = f_g * c + i_g * g_g                # f32 elementwise (v5e-safe)
        h = o_g * jnp.tanh(c)
        hs_ref[pl.ds(t, 1), :] = h             # off the critical path

    # Deferred FC: one matmul + one contiguous (S, P) store.
    out_ref[...] = (jnp.dot(hs_ref[...], wfc_ref[...],
                            preferred_element_type=jnp.float32) + bfc_ref[...])


@jax.jit
def lstm_forward(x, params):
    """x: (S, B, 1) float32 -> (S, P, 1) float32."""
    S, B, _ = x.shape
    H = params["w_hh"].shape[1]                # w_hh: (4H, H), PyTorch order i,f,g,o
    P = params["w_fc"].shape[0]                # w_fc: (P, H)

    # Gate reorder: PyTorch [i, f, g, o]  ->  packed [i, f, o, g]
    perm = (0, 1, 3, 2)

    w_hh = params["w_hh"].astype(jnp.float32).reshape(4, H, H)
    whh_packed = jnp.concatenate([w_hh[k].T for k in perm], axis=1)       # (H, 4H)
    whh_bf16 = whh_packed.astype(jnp.bfloat16)                            # MXU operand

    w_ih = params["w_ih"][:, 0].astype(jnp.float32).reshape(4, H)
    wrow = jnp.concatenate([w_ih[k] for k in perm], axis=0).reshape(1, 4 * H)

    b = (params["b_ih"] + params["b_hh"]).astype(jnp.float32).reshape(4, H)
    bias = jnp.concatenate([b[k] for k in perm], axis=0).reshape(1, 4 * H)

    wfc_t = params["w_fc"].astype(jnp.float32).T                          # (H, P)
    bfc = params["b_fc"].astype(jnp.float32).reshape(1, P)

    # out[:, -1, :] only uses batch row B-1; LSTM batch rows are independent,
    # so drop the dead batch rows before the recurrence.
    x_last = x[:, -1, :].astype(jnp.float32)                              # (S, 1)

    out = pl.pallas_call(
        lstm_fc_kernel,
        out_shape=jax.ShapeDtypeStruct((S, P), jnp.float32),
        grid=(1,),                                   # single invocation; the time
        in_specs=[                                   # loop lives in-kernel
            pl.BlockSpec((S, 1), lambda i: (0, 0)),
            pl.BlockSpec((1, 4 * H), lambda i: (0, 0)),
            pl.BlockSpec((1, 4 * H), lambda i: (0, 0)),
            pl.BlockSpec((H, 4 * H), lambda i: (0, 0)),
            pl.BlockSpec((H, P), lambda i: (0, 0)),
            pl.BlockSpec((1, P), lambda i: (0, 0)),
        ],
        out_specs=pl.BlockSpec((S, P), lambda i: (0, 0)),
        scratch_shapes=[pltpu.VMEM((S, H), jnp.float32)],
        compiler_params=pltpu.CompilerParams(
            dimension_semantics=("arbitrary",)),     # recurrence is strictly serial
    )(x_last, wrow, bias, whh_bf16, wfc_t, bfc)
    # TODO(synk): on v7x, shard independent sequences (if any exist at the call
    # site) over a leading "parallel" grid axis so the 2nd TensorCore isn't idle.

    # (S, P) -> (S, P, 1), matching `fc(out[:, -1, :])[:, :, None]`
    return out[:, :, None]


def init_params(key, hidden_size, predict_len, input_size=1):
    """Deterministic init mimicking PyTorch's U(-1/sqrt(H), 1/sqrt(H))."""
    k = 1.0 / jnp.sqrt(jnp.float32(hidden_size))
    keys = jax.random.split(key, 6)
    u = lambda kk, shape: jax.random.uniform(kk, shape, jnp.float32, -k, k)
    # TODO(synk): only num_layers=1 (the module's default) is implemented.
    return {
        "w_ih": u(keys[0], (4 * hidden_size, input_size)),
        "w_hh": u(keys[1], (4 * hidden_size, hidden_size)),
        "b_ih": u(keys[2], (4 * hidden_size,)),
        "b_hh": u(keys[3], (4 * hidden_size,)),
        "w_fc": u(keys[4], (predict_len, hidden_size)),
        "b_fc": u(keys[5], (predict_len,)),
    }


def ref_forward(x, params):
    """Pure-JAX f32 reference reproducing the exact PyTorch semantics."""
    S, B, _ = x.shape
    H = params["w_hh"].shape[1]
    h = jnp.zeros((B, H), jnp.float32)
    c = jnp.zeros((B, H), jnp.float32)
    hs = []
    for t in range(S):
        gates = (x[t] @ params["w_ih"].T + h @ params["w_hh"].T
                 + params["b_ih"] + params["b_hh"])
        i = jax.nn.sigmoid(gates[:, :H])
        f = jax.nn.sigmoid(gates[:, H:2 * H])
        g = jnp.tanh(gates[:, 2 * H:3 * H])
        o = jax.nn.sigmoid(gates[:, 3 * H:])
        c = f * c + i * g
        h = o * jnp.tanh(c)
        hs.append(h)
    out = jnp.stack(hs)                                      # (S, B, H)
    y = out[:, -1, :] @ params["w_fc"].T + params["b_fc"]    # (S, P)
    return y[:, :, None]                                     # (S, P, 1)


if __name__ == "__main__":
    SEQ, BATCH, HIDDEN, PREDICT = 8, 2, 32, 8

    key = jax.random.PRNGKey(0)
    kx, kp = jax.random.split(key)
    x = jax.random.normal(kx, (SEQ, BATCH, 1), jnp.float32)
    params = init_params(kp, HIDDEN, PREDICT)

    y = jax.block_until_ready(lstm_forward(x, params))
    y_ref = jax.block_until_ready(ref_forward(x, params))

    assert y.shape == (SEQ, PREDICT, 1), y.shape
    # bf16 MXU operands (f32 accumulation) => tolerance loosened vs pure-f32.
    assert jnp.allclose(y, y_ref, atol=2e-2, rtol=2e-2), (
        f"max err {jnp.max(jnp.abs(y - y_ref))}")
    print("KERNEL_OK")
</pallas_src>

<mosaic_0001>
module attributes {stable_mosaic.version = 11 : i64} {
  func.func @lstm_fc_kernel(%arg0: i32, %arg1: memref<8x1xf32, #tpu.memory_space<vmem>>, %arg2: memref<1x128xf32, #tpu.memory_space<vmem>>, %arg3: memref<1x128xf32, #tpu.memory_space<vmem>>, %arg4: memref<32x128xbf16, #tpu.memory_space<vmem>>, %arg5: memref<32x8xf32, #tpu.memory_space<vmem>>, %arg6: memref<1x8xf32, #tpu.memory_space<vmem>>, %arg7: memref<8x8xf32, #tpu.memory_space<vmem>>, %arg8: memref<8x32xf32, #tpu.memory_space<vmem>>) attributes {dimension_semantics = [#tpu.dimension_semantics<arbitrary>], iteration_bounds = array<i64: 1>, scalar_prefetch = 0 : i64, scratch_operands = 1 : i64, tpu.core_type = #tpu.core_type<tc>, window_params = [{pipeline_mode = #tpu.pipeline_mode<synchronous>, transform_indices = @transform_0, window_bounds = array<i64: 8, 1>}, {pipeline_mode = #tpu.pipeline_mode<synchronous>, transform_indices = @transform_1, window_bounds = array<i64: 1, 128>}, {pipeline_mode = #tpu.pipeline_mode<synchronous>, transform_indices = @transform_2, window_bounds = array<i64: 1, 128>}, {pipeline_mode = #tpu.pipeline_mode<synchronous>, transform_indices = @transform_3, window_bounds = array<i64: 32, 128>}, {pipeline_mode = #tpu.pipeline_mode<synchronous>, transform_indices = @transform_4, window_bounds = array<i64: 32, 8>}, {pipeline_mode = #tpu.pipeline_mode<synchronous>, transform_indices = @transform_5, window_bounds = array<i64: 1, 8>}, {pipeline_mode = #tpu.pipeline_mode<synchronous>, transform_indices = @transform_6, window_bounds = array<i64: 8, 8>}]} {
    %c0 = arith.constant 0 : index
    %c0_0 = arith.constant 0 : index
    %0 = vector.load %arg1[%c0, %c0_0] : memref<8x1xf32, #tpu.memory_space<vmem>>, vector<8x1xf32>
    %c0_1 = arith.constant 0 : index
    %c0_2 = arith.constant 0 : index
    %1 = vector.load %arg2[%c0_1, %c0_2] : memref<1x128xf32, #tpu.memory_space<vmem>>, vector<1x128xf32>
    %2 = vector.broadcast %0 : vector<8x1xf32> to vector<8x128xf32>
    %3 = vector.broadcast %1 : vector<1x128xf32> to vector<8x128xf32>
    %4 = arith.mulf %2, %3 : vector<8x128xf32>
    %c0_3 = arith.constant 0 : index
    %c0_4 = arith.constant 0 : index
    %5 = vector.load %arg3[%c0_3, %c0_4] : memref<1x128xf32, #tpu.memory_space<vmem>>, vector<1x128xf32>
    %6 = vector.broadcast %5 : vector<1x128xf32> to vector<8x128xf32>
    %7 = arith.addf %4, %6 : vector<8x128xf32>
    %c0_5 = arith.constant 0 : index
    %c0_6 = arith.constant 0 : index
    %8 = vector.load %arg4[%c0_5, %c0_6] : memref<32x128xbf16, #tpu.memory_space<vmem>>, vector<32x128xbf16>
    %9 = tpu.iota {dimensions = array<i32: 1>} : vector<1x128xi32>
    %c96_i32 = arith.constant 96 : i32
    %10 = vector.broadcast %c96_i32 : i32 to vector<1x128xi32>
    %11 = arith.cmpi slt, %9, %10 : vector<1x128xi32>
    %cst = arith.constant 0.000000e+00 : f32
    %12 = vector.broadcast %cst : f32 to vector<1x32xf32>
    %cst_7 = arith.constant 0.000000e+00 : f32
    %13 = vector.broadcast %cst_7 : f32 to vector<1x32xf32>
    %14 = vector.extract_strided_slice %7 {offsets = [0, 0], sizes = [1, 128], strides = [1, 1]} : vector<8x128xf32> to vector<1x128xf32>
    %15 = arith.truncf %12 : vector<1x32xf32> to vector<1x32xbf16>
    %cst_8 = arith.constant dense<0.000000e+00> : vector<1x128xf32>
    %16 = tpu.matmul %15, %8, %cst_8 {dimension_numbers = #tpu.dot_dimension_numbers<[1], [0], [0], [1], [0, 0, 1, 1], [], []>} : vector<1x32xbf16>, vector<32x128xbf16>, vector<1x128xf32> -> vector<1x128xf32>
    %17 = arith.addf %14, %16 : vector<1x128xf32>
    %18 = arith.negf %17 : vector<1x128xf32>
    %19 = math.exp %18 : vector<1x128xf32>
    %cst_9 = arith.constant 1.000000e+00 : f32
    %20 = vector.broadcast %cst_9 : f32 to vector<1x128xf32>
    %21 = arith.addf %20, %19 : vector<1x128xf32>
    %22 = arith.divf %20, %21 : vector<1x128xf32>
    %23 = math.tanh %17 : vector<1x128xf32>
    %24 = arith.select %11, %22, %23 : vector<1x128xi1>, vector<1x128xf32>
    %25 = vector.extract_strided_slice %24 {offsets = [0, 0], sizes = [1, 32], strides = [1, 1]} : vector<1x128xf32> to vector<1x32xf32>
    %26 = vector.extract_strided_slice %24 {offsets = [0, 32], sizes = [1, 32], strides = [1, 1]} : vector<1x128xf32> to vector<1x32xf32>
    %27 = vector.extract_strided_slice %24 {offsets = [0, 64], sizes = [1, 32], strides = [1, 1]} : vector<1x128xf32> to vector<1x32xf32>
    %28 = vector.extract_strided_slice %24 {offsets = [0, 96], sizes = [1, 32], strides = [1, 1]} : vector<1x128xf32> to vector<1x32xf32>
    %29 = arith.mulf %26, %13 : vector<1x32xf32>
    %30 = arith.mulf %25, %28 : vector<1x32xf32>
    %31 = arith.addf %29, %30 : vector<1x32xf32>
    %32 = math.tanh %31 : vector<1x32xf32>
    %33 = arith.mulf %27, %32 : vector<1x32xf32>
    %c0_10 = arith.constant 0 : index
    %c0_11 = arith.constant 0 : index
    %34 = vector.load %arg8[%c0_10, %c0_11] : memref<8x32xf32, #tpu.memory_space<vmem>>, vector<1x32xf32>
    tpu.vector_store %arg8[%c0_10, %c0_11], %33 {strides = array<i32>} : memref<8x32xf32, #tpu.memory_space<vmem>>, vector<1x32xf32>,
    %35 = vector.extract_strided_slice %7 {offsets = [1, 0], sizes = [1, 128], strides = [1, 1]} : vector<8x128xf32> to vector<1x128xf32>
    %36 = arith.truncf %33 : vector<1x32xf32> to vector<1x32xbf16>
    %cst_12 = arith.constant dense<0.000000e+00> : vector<1x128xf32>
    %37 = tpu.matmul %36, %8, %cst_12 {dimension_numbers = #tpu.dot_dimension_numbers<[1], [0], [0], [1], [0, 0, 1, 1], [], []>} : vector<1x32xbf16>, vector<32x128xbf16>, vector<1x128xf32> -> vector<1x128xf32>
    %38 = arith.addf %35, %37 : vector<1x128xf32>
    %39 = arith.negf %38 : vector<1x128xf32>
    %40 = math.exp %39 : vector<1x128xf32>
    %cst_13 = arith.constant 1.000000e+00 : f32
    %41 = vector.broadcast %cst_13 : f32 to vector<1x128xf32>
    %42 = arith.addf %41, %40 : vector<1x128xf32>
    %43 = arith.divf %41, %42 : vector<1x128xf32>
    %44 = math.tanh %38 : vector<1x128xf32>
    %45 = arith.select %11, %43, %44 : vector<1x128xi1>, vector<1x128xf32>
    %46 = vector.extract_strided_slice %45 {offsets = [0, 0], sizes = [1, 32], strides = [1, 1]} : vector<1x128xf32> to vector<1x32xf32>
    %47 = vector.extract_strided_slice %45 {offsets = [0, 32], sizes = [1, 32], strides = [1, 1]} : vector<1x128xf32> to vector<1x32xf32>
    %48 = vector.extract_strided_slice %45 {offsets = [0, 64], sizes = [1, 32], strides = [1, 1]} : vector<1x128xf32> to vector<1x32xf32>
    %49 = vector.extract_strided_slice %45 {offsets = [0, 96], sizes = [1, 32], strides = [1, 1]} : vector<1x128xf32> to vector<1x32xf32>
    %50 = arith.mulf %47, %31 : vector<1x32xf32>
    %51 = arith.mulf %46, %49 : vector<1x32xf32>
    %52 = arith.addf %50, %51 : vector<1x32xf32>
    %53 = math.tanh %52 : vector<1x32xf32>
    %54 = arith.mulf %48, %53 : vector<1x32xf32>
    %c1 = arith.constant 1 : index
    %c0_14 = arith.constant 0 : index
    %55 = vector.load %arg8[%c1, %c0_14] : memref<8x32xf32, #tpu.memory_space<vmem>>, vector<1x32xf32>
    tpu.vector_store %arg8[%c1, %c0_14], %54 {strides = array<i32>} : memref<8x32xf32, #tpu.memory_space<vmem>>, vector<1x32xf32>,
    %56 = vector.extract_strided_slice %7 {offsets = [2, 0], sizes = [1, 128], strides = [1, 1]} : vector<8x128xf32> to vector<1x128xf32>
    %57 = arith.truncf %54 : vector<1x32xf32> to vector<1x32xbf16>
    %cst_15 = arith.constant dense<0.000000e+00> : vector<1x128xf32>
    %58 = tpu.matmul %57, %8, %cst_15 {dimension_numbers = #tpu.dot_dimension_numbers<[1], [0], [0], [1], [0, 0, 1, 1], [], []>} : vector<1x32xbf16>, vector<32x128xbf16>, vector<1x128xf32> -> vector<1x128xf32>
    %59 = arith.addf %56, %58 : vector<1x128xf32>
    %60 = arith.negf %59 : vector<1x128xf32>
    %61 = math.exp %60 : vector<1x128xf32>
    %cst_16 = arith.constant 1.000000e+00 : f32
    %62 = vector.broadcast %cst_16 : f32 to vector<1x128xf32>
    %63 = arith.addf %62, %61 : vector<1x128xf32>
    %64 = arith.divf %62, %63 : vector<1x128xf32>
    %65 = math.tanh %59 : vector<1x128xf32>
    %66 = arith.select %11, %64, %65 : vector<1x128xi1>, vector<1x128xf32>
    %67 = vector.extract_strided_slice %66 {offsets = [0, 0], sizes = [1, 32], strides = [1, 1]} : vector<1x128xf32> to vector<1x32xf32>
    %68 = vector.extract_strided_slice %66 {offsets = [0, 32], sizes = [1, 32], strides = [1, 1]} : vector<1x128xf32> to vector<1x32xf32>
    %69 = vector.extract_strided_slice %66 {offsets = [0, 64], sizes = [1, 32], strides = [1, 1]} : vector<1x128xf32> to vector<1x32xf32>
    %70 = vector.extract_strided_slice %66 {offsets = [0, 96], sizes = [1, 32], strides = [1, 1]} : vector<1x128xf32> to vector<1x32xf32>
    %71 = arith.mulf %68, %52 : vector<1x32xf32>
    %72 = arith.mulf %67, %70 : vector<1x32xf32>
    %73 = arith.addf %71, %72 : vector<1x32xf32>
    %74 = math.tanh %73 : vector<1x32xf32>
    %75 = arith.mulf %69, %74 : vector<1x32xf32>
    %c2 = arith.constant 2 : index
    %c0_17 = arith.constant 0 : index
    %76 = vector.load %arg8[%c2, %c0_17] : memref<8x32xf32, #tpu.memory_space<vmem>>, vector<1x32xf32>
    tpu.vector_store %arg8[%c2, %c0_17], %75 {strides = array<i32>} : memref<8x32xf32, #tpu.memory_space<vmem>>, vector<1x32xf32>,
    %77 = vector.extract_strided_slice %7 {offsets = [3, 0], sizes = [1, 128], strides = [1, 1]} : vector<8x128xf32> to vector<1x128xf32>
    %78 = arith.truncf %75 : vector<1x32xf32> to vector<1x32xbf16>
    %cst_18 = arith.constant dense<0.000000e+00> : vector<1x128xf32>
    %79 = tpu.matmul %78, %8, %cst_18 {dimension_numbers = #tpu.dot_dimension_numbers<[1], [0], [0], [1], [0, 0, 1, 1], [], []>} : vector<1x32xbf16>, vector<32x128xbf16>, vector<1x128xf32> -> vector<1x128xf32>
    %80 = arith.addf %77, %79 : vector<1x128xf32>
    %81 = arith.negf %80 : vector<1x128xf32>
    %82 = math.exp %81 : vector<1x128xf32>
    %cst_19 = arith.constant 1.000000e+00 : f32
    %83 = vector.broadcast %cst_19 : f32 to vector<1x128xf32>
    %84 = arith.addf %83, %82 : vector<1x128xf32>
    %85 = arith.divf %83, %84 : vector<1x128xf32>
    %86 = math.tanh %80 : vector<1x128xf32>
    %87 = arith.select %11, %85, %86 : vector<1x128xi1>, vector<1x128xf32>
    %88 = vector.extract_strided_slice %87 {offsets = [0, 0], sizes = [1, 32], strides = [1, 1]} : vector<1x128xf32> to vector<1x32xf32>
    %89 = vector.extract_strided_slice %87 {offsets = [0, 32], sizes = [1, 32], strides = [1, 1]} : vector<1x128xf32> to vector<1x32xf32>
    %90 = vector.extract_strided_slice %87 {offsets = [0, 64], sizes = [1, 32], strides = [1, 1]} : vector<1x128xf32> to vector<1x32xf32>
    %91 = vector.extract_strided_slice %87 {offsets = [0, 96], sizes = [1, 32], strides = [1, 1]} : vector<1x128xf32> to vector<1x32xf32>
    %92 = arith.mulf %89, %73 : vector<1x32xf32>
    %93 = arith.mulf %88, %91 : vector<1x32xf32>
    %94 = arith.addf %92, %93 : vector<1x32xf32>
    %95 = math.tanh %94 : vector<1x32xf32>
    %96 = arith.mulf %90, %95 : vector<1x32xf32>
    %c3 = arith.constant 3 : index
    %c0_20 = arith.constant 0 : index
    %97 = vector.load %arg8[%c3, %c0_20] : memref<8x32xf32, #tpu.memory_space<vmem>>, vector<1x32xf32>
    tpu.vector_store %arg8[%c3, %c0_20], %96 {strides = array<i32>} : memref<8x32xf32, #tpu.memory_space<vmem>>, vector<1x32xf32>,
    %98 = vector.extract_strided_slice %7 {offsets = [4, 0], sizes = [1, 128], strides = [1, 1]} : vector<8x128xf32> to vector<1x128xf32>
    %99 = arith.truncf %96 : vector<1x32xf32> to vector<1x32xbf16>
    %cst_21 = arith.constant dense<0.000000e+00> : vector<1x128xf32>
    %100 = tpu.matmul %99, %8, %cst_21 {dimension_numbers = #tpu.dot_dimension_numbers<[1], [0], [0], [1], [0, 0, 1, 1], [], []>} : vector<1x32xbf16>, vector<32x128xbf16>, vector<1x128xf32> -> vector<1x128xf32>
    %101 = arith.addf %98, %100 : vector<1x128xf32>
    %102 = arith.negf %101 : vector<1x128xf32>
    %103 = math.exp %102 : vector<1x128xf32>
    %cst_22 = arith.constant 1.000000e+00 : f32
    %104 = vector.broadcast %cst_22 : f32 to vector<1x128xf32>
    %105 = arith.addf %104, %103 : vector<1x128xf32>
    %106 = arith.divf %104, %105 : vector<1x128xf32>
    %107 = math.tanh %101 : vector<1x128xf32>
    %108 = arith.select %11, %106, %107 : vector<1x128xi1>, vector<1x128xf32>
    %109 = vector.extract_strided_slice %108 {offsets = [0, 0], sizes = [1, 32], strides = [1, 1]} : vector<1x128xf32> to vector<1x32xf32>
    %110 = vector.extract_strided_slice %108 {offsets = [0, 32], sizes = [1, 32], strides = [1, 1]} : vector<1x128xf32> to vector<1x32xf32>
    %111 = vector.extract_strided_slice %108 {offsets = [0, 64], sizes = [1, 32], strides = [1, 1]} : vector<1x128xf32> to vector<1x32xf32>
    %112 = vector.extract_strided_slice %108 {offsets = [0, 96], sizes = [1, 32], strides = [1, 1]} : vector<1x128xf32> to vector<1x32xf32>
    %113 = arith.mulf %110, %94 : vector<1x32xf32>
    %114 = arith.mulf %109, %112 : vector<1x32xf32>
    %115 = arith.addf %113, %114 : vector<1x32xf32>
    %116 = math.tanh %115 : vector<1x32xf32>
    %117 = arith.mulf %111, %116 : vector<1x32xf32>
    %c4 = arith.constant 4 : index
    %c0_23 = arith.constant 0 : index
    %118 = vector.load %arg8[%c4, %c0_23] : memref<8x32xf32, #tpu.memory_space<vmem>>, vector<1x32xf32>
    tpu.vector_store %arg8[%c4, %c0_23], %117 {strides = array<i32>} : memref<8x32xf32, #tpu.memory_space<vmem>>, vector<1x32xf32>,
    %119 = vector.extract_strided_slice %7 {offsets = [5, 0], sizes = [1, 128], strides = [1, 1]} : vector<8x128xf32> to vector<1x128xf32>
    %120 = arith.truncf %117 : vector<1x32xf32> to vector<1x32xbf16>
    %cst_24 = arith.constant dense<0.000000e+00> : vector<1x128xf32>
    %121 = tpu.matmul %120, %8, %cst_24 {dimension_numbers = #tpu.dot_dimension_numbers<[1], [0], [0], [1], [0, 0, 1, 1], [], []>} : vector<1x32xbf16>, vector<32x128xbf16>, vector<1x128xf32> -> vector<1x128xf32>
    %122 = arith.addf %119, %121 : vector<1x128xf32>
    %123 = arith.negf %122 : vector<1x128xf32>
    %124 = math.exp %123 : vector<1x128xf32>
    %cst_25 = arith.constant 1.000000e+00 : f32
    %125 = vector.broadcast %cst_25 : f32 to vector<1x128xf32>
    %126 = arith.addf %125, %124 : vector<1x128xf32>
    %127 = arith.divf %125, %126 : vector<1x128xf32>
    %128 = math.tanh %122 : vector<1x128xf32>
    %129 = arith.select %11, %127, %128 : vector<1x128xi1>, vector<1x128xf32>
    %130 = vector.extract_strided_slice %129 {offsets = [0, 0], sizes = [1, 32], strides = [1, 1]} : vector<1x128xf32> to vector<1x32xf32>
    %131 = vector.extract_strided_slice %129 {offsets = [0, 32], sizes = [1, 32], strides = [1, 1]} : vector<1x128xf32> to vector<1x32xf32>
    %132 = vector.extract_strided_slice %129 {offsets = [0, 64], sizes = [1, 32], strides = [1, 1]} : vector<1x128xf32> to vector<1x32xf32>
    %133 = vector.extract_strided_slice %129 {offsets = [0, 96], sizes = [1, 32], strides = [1, 1]} : vector<1x128xf32> to vector<1x32xf32>
    %134 = arith.mulf %131, %115 : vector<1x32xf32>
    %135 = arith.mulf %130, %133 : vector<1x32xf32>
    %136 = arith.addf %134, %135 : vector<1x32xf32>
    %137 = math.tanh %136 : vector<1x32xf32>
    %138 = arith.mulf %132, %137 : vector<1x32xf32>
    %c5 = arith.constant 5 : index
    %c0_26 = arith.constant 0 : index
    %139 = vector.load %arg8[%c5, %c0_26] : memref<8x32xf32, #tpu.memory_space<vmem>>, vector<1x32xf32>
    tpu.vector_store %arg8[%c5, %c0_26], %138 {strides = array<i32>} : memref<8x32xf32, #tpu.memory_space<vmem>>, vector<1x32xf32>,
    %140 = vector.extract_strided_slice %7 {offsets = [6, 0], sizes = [1, 128], strides = [1, 1]} : vector<8x128xf32> to vector<1x128xf32>
    %141 = arith.truncf %138 : vector<1x32xf32> to vector<1x32xbf16>
    %cst_27 = arith.constant dense<0.000000e+00> : vector<1x128xf32>
    %142 = tpu.matmul %141, %8, %cst_27 {dimension_numbers = #tpu.dot_dimension_numbers<[1], [0], [0], [1], [0, 0, 1, 1], [], []>} : vector<1x32xbf16>, vector<32x128xbf16>, vector<1x128xf32> -> vector<1x128xf32>
    %143 = arith.addf %140, %142 : vector<1x128xf32>
    %144 = arith.negf %143 : vector<1x128xf32>
    %145 = math.exp %144 : vector<1x128xf32>
    %cst_28 = arith.constant 1.000000e+00 : f32
    %146 = vector.broadcast %cst_28 : f32 to vector<1x128xf32>
    %147 = arith.addf %146, %145 : vector<1x128xf32>
    %148 = arith.divf %146, %147 : vector<1x128xf32>
    %149 = math.tanh %143 : vector<1x128xf32>
    %150 = arith.select %11, %148, %149 : vector<1x128xi1>, vector<1x128xf32>
    %151 = vector.extract_strided_slice %150 {offsets = [0, 0], sizes = [1, 32], strides = [1, 1]} : vector<1x128xf32> to vector<1x32xf32>
    %152 = vector.extract_strided_slice %150 {offsets = [0, 32], sizes = [1, 32], strides = [1, 1]} : vector<1x128xf32> to vector<1x32xf32>
    %153 = vector.extract_strided_slice %150 {offsets = [0, 64], sizes = [1, 32], strides = [1, 1]} : vector<1x128xf32> to vector<1x32xf32>
    %154 = vector.extract_strided_slice %150 {offsets = [0, 96], sizes = [1, 32], strides = [1, 1]} : vector<1x128xf32> to vector<1x32xf32>
    %155 = arith.mulf %152, %136 : vector<1x32xf32>
    %156 = arith.mulf %151, %154 : vector<1x32xf32>
    %157 = arith.addf %155, %156 : vector<1x32xf32>
    %158 = math.tanh %157 : vector<1x32xf32>
    %159 = arith.mulf %153, %158 : vector<1x32xf32>
    %c6 = arith.constant 6 : index
    %c0_29 = arith.constant 0 : index
    %160 = vector.load %arg8[%c6, %c0_29] : memref<8x32xf32, #tpu.memory_space<vmem>>, vector<1x32xf32>
    tpu.vector_store %arg8[%c6, %c0_29], %159 {strides = array<i32>} : memref<8x32xf32, #tpu.memory_space<vmem>>, vector<1x32xf32>,
    %161 = vector.extract_strided_slice %7 {offsets = [7, 0], sizes = [1, 128], strides = [1, 1]} : vector<8x128xf32> to vector<1x128xf32>
    %162 = arith.truncf %159 : vector<1x32xf32> to vector<1x32xbf16>
    %cst_30 = arith.constant dense<0.000000e+00> : vector<1x128xf32>
    %163 = tpu.matmul %162, %8, %cst_30 {dimension_numbers = #tpu.dot_dimension_numbers<[1], [0], [0], [1], [0, 0, 1, 1], [], []>} : vector<1x32xbf16>, vector<32x128xbf16>, vector<1x128xf32> -> vector<1x128xf32>
    %164 = arith.addf %161, %163 : vector<1x128xf32>
    %165 = arith.negf %164 : vector<1x128xf32>
    %166 = math.exp %165 : vector<1x128xf32>
    %cst_31 = arith.constant 1.000000e+00 : f32
    %167 = vector.broadcast %cst_31 : f32 to vector<1x128xf32>
    %168 = arith.addf %167, %166 : vector<1x128xf32>
    %169 = arith.divf %167, %168 : vector<1x128xf32>
    %170 = math.tanh %164 : vector<1x128xf32>
    %171 = arith.select %11, %169, %170 : vector<1x128xi1>, vector<1x128xf32>
    %172 = vector.extract_strided_slice %171 {offsets = [0, 0], sizes = [1, 32], strides = [1, 1]} : vector<1x128xf32> to vector<1x32xf32>
    %173 = vector.extract_strided_slice %171 {offsets = [0, 32], sizes = [1, 32], strides = [1, 1]} : vector<1x128xf32> to vector<1x32xf32>
    %174 = vector.extract_strided_slice %171 {offsets = [0, 64], sizes = [1, 32], strides = [1, 1]} : vector<1x128xf32> to vector<1x32xf32>
    %175 = vector.extract_strided_slice %171 {offsets = [0, 96], sizes = [1, 32], strides = [1, 1]} : vector<1x128xf32> to vector<1x32xf32>
    %176 = arith.mulf %173, %157 : vector<1x32xf32>
    %177 = arith.mulf %172, %175 : vector<1x32xf32>
    %178 = arith.addf %176, %177 : vector<1x32xf32>
    %179 = math.tanh %178 : vector<1x32xf32>
    %180 = arith.mulf %174, %179 : vector<1x32xf32>
    %c7 = arith.constant 7 : index
    %c0_32 = arith.constant 0 : index
    %181 = vector.load %arg8[%c7, %c0_32] : memref<8x32xf32, #tpu.memory_space<vmem>>, vector<1x32xf32>
    tpu.vector_store %arg8[%c7, %c0_32], %180 {strides = array<i32>} : memref<8x32xf32, #tpu.memory_space<vmem>>, vector<1x32xf32>,
    %c0_33 = arith.constant 0 : index
    %c0_34 = arith.constant 0 : index
    %182 = vector.load %arg8[%c0_33, %c0_34] : memref<8x32xf32, #tpu.memory_space<vmem>>, vector<8x32xf32>
    %c0_35 = arith.constant 0 : index
    %c0_36 = arith.constant 0 : index
    %183 = vector.load %arg5[%c0_35, %c0_36] : memref<32x8xf32, #tpu.memory_space<vmem>>, vector<32x8xf32>
    %cst_37 = arith.constant dense<0.000000e+00> : vector<8x8xf32>
    %184 = tpu.matmul %182, %183, %cst_37 {dimension_numbers = #tpu.dot_dimension_numbers<[1], [0], [0], [1], [0, 0, 1, 1], [], []>} : vector<8x32xf32>, vector<32x8xf32>, vector<8x8xf32> -> vector<8x8xf32>
    %c0_38 = arith.constant 0 : index
    %c0_39 = arith.constant 0 : index
    %185 = vector.load %arg6[%c0_38, %c0_39] : memref<1x8xf32, #tpu.memory_space<vmem>>, vector<1x8xf32>
    %186 = vector.broadcast %185 : vector<1x8xf32> to vector<8x8xf32>
    %187 = arith.addf %184, %186 : vector<8x8xf32>
    %c0_40 = arith.constant 0 : index
    %c0_41 = arith.constant 0 : index
    %188 = vector.load %arg7[%c0_40, %c0_41] : memref<8x8xf32, #tpu.memory_space<vmem>>, vector<8x8xf32>
    tpu.vector_store %arg7[%c0_40, %c0_41], %187 {strides = array<i32>} : memref<8x8xf32, #tpu.memory_space<vmem>>, vector<8x8xf32>,
    return
  }
  func.func @transform_0(%arg0: i32) -> (i32, i32) {
    %c0_i32 = arith.constant 0 : i32
    %c0_i32_0 = arith.constant 0 : i32
    %c0_i32_1 = arith.constant 0 : i32
    return %c0_i32, %c0_i32_0 : i32, i32
  }
  func.func @transform_1(%arg0: i32) -> (i32, i32) {
    %c0_i32 = arith.constant 0 : i32
    %c0_i32_0 = arith.constant 0 : i32
    %c0_i32_1 = arith.constant 0 : i32
    return %c0_i32, %c0_i32_0 : i32, i32
  }
  func.func @transform_2(%arg0: i32) -> (i32, i32) {
    %c0_i32 = arith.constant 0 : i32
    %c0_i32_0 = arith.constant 0 : i32
    %c0_i32_1 = arith.constant 0 : i32
    return %c0_i32, %c0_i32_0 : i32, i32
  }
  func.func @transform_3(%arg0: i32) -> (i32, i32) {
    %c0_i32 = arith.constant 0 : i32
    %c0_i32_0 = arith.constant 0 : i32
    %c0_i32_1 = arith.constant 0 : i32
    return %c0_i32, %c0_i32_0 : i32, i32
  }
  func.func @transform_4(%arg0: i32) -> (i32, i32) {
    %c0_i32 = arith.constant 0 : i32
    %c0_i32_0 = arith.constant 0 : i32
    %c0_i32_1 = arith.constant 0 : i32
    return %c0_i32, %c0_i32_0 : i32, i32
  }
  func.func @transform_5(%arg0: i32) -> (i32, i32) {
    %c0_i32 = arith.constant 0 : i32
    %c0_i32_0 = arith.constant 0 : i32
    %c0_i32_1 = arith.constant 0 : i32
    return %c0_i32, %c0_i32_0 : i32, i32
  }
  func.func @transform_6(%arg0: i32) -> (i32, i32) {
    %c0_i32 = arith.constant 0 : i32
    %c0_i32_0 = arith.constant 0 : i32
    %c0_i32_1 = arith.constant 0 : i32
    return %c0_i32, %c0_i32_0 : i32, i32
  }
}

</mosaic_0001>

<bundles_post_ra>
// kernel: lstm_forward.1
= control target key start
LH: loop header
LB: loop body
LE: loop exit
PB: predicated region body
PF: predicated region fallthrough
CT: control target
= control target key end

     0   :  { %v1078_v1 = vmov 0.0   ;;  %vm1079_vm0 = vmmov 0   ;;  %v1080_v4 = vmov 0   ;;  %s1322_s0 = inlined_call_operand.vmem [shape: f32[8,1], index: 0, kind: input, shape index: {}]   ;;  %s1323_s1 = inlined_call_operand.vmem [shape: f32[1,128], index: 1, kind: input, shape index: {}]   ;;  %s1324_s2 = inlined_call_operand.vmem [shape: f32[1,128], index: 2, kind: input, shape index: {}]   ;;  %s1325_s3 = inlined_call_operand.vmem [shape: bf16[32,128], index: 3, kind: input, shape index: {}]   ;;  %s1326_s4 = inlined_call_operand.vmem [shape: f32[32,8], index: 4, kind: input, shape index: {}]   ;;  %s1327_s5 = inlined_call_operand.vmem [shape: f32[1,8], index: 5, kind: input, shape index: {}]   ;;  %s1328_s6 = inlined_call_operand.hbm [shape: f32[8,8], index: 6, kind: output, shape index: {}]  }
   0x1   :  { %v1123_v0 = vld [vmem:[%s1325_s3] sm:$0xff]   ;;  %899 = vmatprep.subr.bf16.mxu0 %v1078_v1  ;;  %907 = vmatprep.subr.bf16.mxu1 %v1078_v1  ;;  %v1131_v2 = vld [vmem:[%s1325_s3 + $0x8] sm:$0xff]  }
   0x2   :  { %900 = vmatpush3.bf16.msra.mxu0 %v1123_v0  ;;  %903 = vmatprep.mubr.msk.bf16.mxu0 %vm1079_vm0, %v1078_v1  ;;  %v25_v3 = vld [vmem:[%s1322_s0] sm:$0xff] }
   0x3   :  { %901 = vmatprep.subr.bf16.mxu0 %v1078_v1  ;;  %987 = vset.pattern.permute.xlu0 %v1080_v4 }
   0x4   :  { %11 = vsyncpa [#allocation4], 0  ;;  %29 = vperm.xlu0 %987, %v25_v3   ;;  %908 = vmatpush3.bf16.msra.mxu1 %v1123_v0  ;;  %v849_v5 = vld [vmem:[%s1323_s1] ss:$0 sm:$0xff]  ;;  %v51_v18 = vlaneseq  ;;  %s1081_s1 = smov 32   ;;  %vm66_vm2 = vcmask 261120  }
   0x5   :  { %909 = vmatprep.subr.bf16.mxu1 %v1078_v1  ;;  %911 = vmatprep.mubr.msk.bf16.mxu1 %vm1079_vm0, %v1078_v1  ;;  %v850_v8 = vld [vmem:[%s1324_s2] ss:$0 sm:$0xff]  ;;  %s1082_s2 = smov 64   ;;  %vm140_vm3 = vcmask 253952   ;;  %vm312_vm4 = vcmask 256002   ;;  %vm486_vm5 = vcmask 258052  }
   0x6   :  { %902 = vmatpush3.bf16.msra.mxu0 %v1131_v2  ;;  %v1162_v19 = vand.u32 127, %v51_v18  ;;  %vm660_vm6 = vcmask 260102   ;;  %vm225_vm7 = vcmask 254977   ;;  %vm398_vm8 = vcmask 257027   ;;  %s1084_s14 = smov [#allocation3]  }
   0x7   :  { %915 = vmatprep.subr.bf16.mxu0 %v1078_v1  ;;  %vm572_vm9 = vcmask 259077   ;;  %vm746_vm10 = vcmask 261127   ;;  %s841_s15 = sshll.u32 %s1084_s14, 4  ;;  %vm833_vm11 = vcmask 64512   ;;  %s842_s15 = int_to_ptr.vmem [resolvable:$true] %s841_s15 }
   0x8   :  { %910 = vmatpush3.bf16.msra.mxu1 %v1131_v2  ;;  %vm53_vm1 = vcmp.lt.s32.totalorder %v1162_v19, 96  ;;  %s1054_s16 = scalar_lea.vmem %s842_s15, 128  ;;  %p1059_p1 = scmp.lt.s32.totalorder %s842_s15, %s842_s15 }
   0x9   :  { %904 = vmatmul.mubr.bf16.vlgmr.msra.gmra.mrb[0].mxu0 %v1080_v4  ;;  %923 = vmatprep.subr.bf16.mxu1 %v1078_v1  ;;  %p1055_p0 = scmp.ne.s32.totalorder %s842_s15, %s1054_s16  ;;  %p1060_p2 = scmp.lt.s32.totalorder %s1054_s16, %s1054_s16 }
   0xa   :  { %916 = vmatpush3.bf16.msra.mxu0 %v1123_v0  ;;  %919 = vmatprep.mubr.msk.bf16.mxu0 %vm1079_vm0, %v1078_v1 }
   0xb   :  { %917 = vmatprep.subr.bf16.mxu0 %v1078_v1  ;;  %p1061_p3 = por %p1060_p2, %p1059_p1 }
   0xd   :  { %p1062_p4 = pnand %p1061_p3, %p1055_p0 }
   0xe   :  { %918 = vmatpush3.bf16.msra.mxu0 %v1131_v2 }
   0xf   :  { %931 = vmatprep.subr.bf16.mxu0 %v1078_v1 }
  0x83   :  { %v30_v6 = vpop.permute.xlu0 %29 }
  0x84   :  { %v38_v7 = vmul.f32 %v849_v5, %v30_v6 }
  0x86   :  { %v1159_v9 = vadd.f32 %v850_v8, %v38_v7 }
  0xdc   :  { %v104_v10 = vpop.f32.mrb[0].mxu0 }
  0xdd   :  { %v110_v11 = vadd.f32 %v104_v10, %v1159_v9  ;;  %v905_v12 = vpop.f32.mrb[1].mxu0 }
  0xde   :  { %v107_v13 = vpop.f32.mrb[2].mxu0 }
  0xdf   :  { %v853_v14 = vmul.f32 -1.442695, %v110_v11  ;;  %v906_v15 = vpop.f32.mrb[3].mxu0 }
  0xe1   :  { %990 = vpow2.f32 %v853_v14 }
  0xe2   :  { %992 = vtanh.f32 %v110_v11 }
  0xeb   :  { %v991_v16 = vpop.eup %990 }
  0xec   :  { %v114_v17 = vadd.f32 1.0, %v991_v16  ;;  %v993_v20 = vpop.eup %992 }
  0xee   :  { %994 = vrcp.f32 %v114_v17 }
  0xf8   :  { %v995_v21 = vpop.eup %994 }
  0xf9   :  { %v118_v22 = vsel %vm53_vm1, %v995_v21, %v993_v20 }
  0xfa   :  { %121 = vrot.lane.b32.xlu0 %v118_v22, %s1081_s1  ;;  %v119_v25 = vmul.f32 0.0, %v118_v22 }
 0x16c   :  { %v122_v23 = vpop.permute.xlu0 %121 }
 0x16d   :  { %v124_v24 = vmul.f32 %v122_v23, %v118_v22 }
 0x16f   :  { %126 = vrot.lane.b32.xlu1 %v124_v24, %s1081_s1 }
 0x1e1   :  { %v127_v26 = vpop.permute.xlu1 %126 }
 0x1e2   :  { %v129_v27 = vadd.f32 %v127_v26, %v119_v25 }
 0x1e4   :  { %996 = vtanh.f32 %v129_v27  ;;  %v202_v47 = vrot.slane %v129_v27, 7 }
 0x1ee   :  { %v997_v28 = vpop.eup %996 }
 0x1ef   :  { %132 = vrot.lane.b32.xlu1 %v997_v28, %s1081_s1 }
 0x261   :  { %v133_v29 = vpop.permute.xlu1 %132 }
 0x262   :  { %v1170_v30 = vmul.f32 %v133_v29, %v118_v22 }
 0x264   :  { %v142_v31 = vpack.c.bf16 %v1170_v30, %v1170_v30 }
 0x266   :  { %144 = vrot.lane.b32.xlu0 %v142_v31, %s1082_s2 }
 0x2d8   :  { %v145_v32 = vpop.permute.xlu0 %144 }
 0x2d9   :  { %912 = vmatmul.mubr.msk.bf16.vlgmr.msra.gmra.mrb[0].mxu1 %vm66_vm2, %v145_v32 }
 0x2da   :  { %924 = vmatpush3.bf16.msra.mxu1 %v1123_v0  ;;  %927 = vmatprep.mubr.msk.bf16.mxu1 %vm1079_vm0, %v1078_v1 }
 0x2db   :  { %925 = vmatprep.subr.bf16.mxu1 %v1078_v1 }
 0x2de   :  { %926 = vmatpush3.bf16.msra.mxu1 %v1131_v2 }
 0x2df   :  { %939 = vmatprep.subr.bf16.mxu1 %v1078_v1 }
 0x3ac   :  { %v183_v33 = vpop.f32.mrb[0].mxu1 }
 0x3ad   :  { %v190_v34 = vrot.slane %v183_v33, 7  ;;  %v913_v35 = vpop.f32.mrb[1].mxu1 }
 0x3ae   :  { %v186_v36 = vpop.f32.mrb[2].mxu1 }
 0x3af   :  { %v192_v37 = vadd.f32 %v190_v34, %v1159_v9  ;;  %v914_v38 = vpop.f32.mrb[3].mxu1 }
 0x3b1   :  { %v855_v39 = vmul.f32 -1.442695, %v192_v37 }
 0x3b3   :  { %998 = vpow2.f32 %v855_v39 }
 0x3b4   :  { %1000 = vtanh.f32 %v192_v37 }
 0x3bd   :  { %v999_v40 = vpop.eup %998 }
 0x3be   :  { %v196_v41 = vadd.f32 1.0, %v999_v40  ;;  %v1001_v42 = vpop.eup %1000 }
 0x3c0   :  { %1002 = vrcp.f32 %v196_v41 }
 0x3ca   :  { %v1003_v43 = vpop.eup %1002 }
 0x3cb   :  { %v200_v44 = vsel %vm53_vm1, %v1003_v43, %v1001_v42 }
 0x3cc   :  { %206 = vrot.lane.b32.xlu1 %v200_v44, %s1081_s1  ;;  %v204_v48 = vmul.f32 %v202_v47, %v200_v44 }
 0x43e   :  { %v207_v45 = vpop.permute.xlu1 %206 }
 0x43f   :  { %v209_v46 = vmul.f32 %v207_v45, %v200_v44 }
 0x441   :  { %211 = vrot.lane.b32.xlu0 %v209_v46, %s1081_s1 }
 0x4b3   :  { %v212_v49 = vpop.permute.xlu0 %211 }
 0x4b4   :  { %v214_v50 = vadd.f32 %v212_v49, %v204_v48 }
 0x4b6   :  { %1004 = vtanh.f32 %v214_v50  ;;  %v289_v11 = vrot.slane %v214_v50, 7 }
 0x4c0   :  { %v1005_v51 = vpop.eup %1004 }
 0x4c1   :  { %217 = vrot.lane.b32.xlu1 %v1005_v51, %s1081_s1 }
 0x533   :  { %v218_v52 = vpop.permute.xlu1 %217 }
 0x534   :  { %v1188_v53 = vmul.f32 %v218_v52, %v200_v44 }
 0x536   :  { %v227_v54 = vpack.c.bf16 %v1188_v53, %v1188_v53 }
 0x538   :  { %v229_v55 = vshrl.u32 %v227_v54, 16 }
 0x53a   :  { %231 = vrot.lane.b32.xlu0 %v229_v55, %s1082_s2 }
 0x5ac   :  { %v232_v56 = vpop.permute.xlu0 %231 }
 0x5ad   :  { %920 = vmatmul.mubr.msk.bf16.vlgmr.msra.gmra.mrb[4].mxu0 %vm66_vm2, %v232_v56 }
 0x5ae   :  { %932 = vmatpush3.bf16.msra.mxu0 %v1123_v0  ;;  %935 = vmatprep.mubr.msk.bf16.mxu0 %vm1079_vm0, %v1078_v1 }
 0x5af   :  { %933 = vmatprep.subr.bf16.mxu0 %v1078_v1 }
 0x5b2   :  { %934 = vmatpush3.bf16.msra.mxu0 %v1131_v2 }
 0x5b3   :  { %947 = vmatprep.subr.bf16.mxu0 %v1078_v1 }
 0x680   :  { %v270_v57 = vpop.f32.mrb[4].mxu0 }
 0x681   :  { %v277_v58 = vrot.slane %v270_v57, 6  ;;  %v921_v59 = vpop.f32.mrb[5].mxu0 }
 0x682   :  { %v273_v60 = vpop.f32.mrb[6].mxu0 }
 0x683   :  { %v279_v61 = vadd.f32 %v277_v58, %v1159_v9  ;;  %v922_v62 = vpop.f32.mrb[7].mxu0 }
 0x685   :  { %v857_v63 = vmul.f32 -1.442695, %v279_v61 }
 0x687   :  { %1006 = vpow2.f32 %v857_v63 }
 0x688   :  { %1008 = vtanh.f32 %v279_v61 }
 0x691   :  { %v1007_v3 = vpop.eup %1006 }
 0x692   :  { %v283_v4 = vadd.f32 1.0, %v1007_v3  ;;  %v1009_v5 = vpop.eup %1008 }
 0x694   :  { %1010 = vrcp.f32 %v283_v4 }
 0x69e   :  { %v1011_v6 = vpop.eup %1010 }
 0x69f   :  { %v287_v7 = vsel %vm53_vm1, %v1011_v6, %v1009_v5 }
 0x6a0   :  { %293 = vrot.lane.b32.xlu1 %v287_v7, %s1081_s1  ;;  %v291_v12 = vmul.f32 %v289_v11, %v287_v7 }
 0x712   :  { %v294_v8 = vpop.permute.xlu1 %293 }
 0x713   :  { %v296_v10 = vmul.f32 %v294_v8, %v287_v7 }
 0x715   :  { %298 = vrot.lane.b32.xlu0 %v296_v10, %s1081_s1 }
 0x787   :  { %v299_v13 = vpop.permute.xlu0 %298 }
 0x788   :  { %v301_v14 = vadd.f32 %v299_v13, %v291_v12 }
 0x78a   :  { %1012 = vtanh.f32 %v301_v14  ;;  %v375_v37 = vrot.slane %v301_v14, 7 }
 0x794   :  { %v1013_v15 = vpop.eup %1012 }
 0x795   :  { %304 = vrot.lane.b32.xlu1 %v1013_v15, %s1081_s1 }
 0x807   :  { %v305_v16 = vpop.permute.xlu1 %304 }
 0x808   :  { %v1206_v17 = vmul.f32 %v305_v16, %v287_v7 }
 0x80a   :  { %v314_v18 = vpack.c.bf16 %v1206_v17, %v1206_v17 }
 0x80c   :  { %v316_v20 = vrot.slane %v314_v18, 1 }
 0x80e   :  { %317 = vrot.lane.b32.xlu0 %v316_v20, %s1082_s2 }
 0x880   :  { %v318_v21 = vpop.permute.xlu0 %317 }
 0x881   :  { %928 = vmatmul.mubr.msk.bf16.vlgmr.msra.gmra.mrb[4].mxu1 %vm66_vm2, %v318_v21 }
 0x882   :  { %940 = vmatpush3.bf16.msra.mxu1 %v1123_v0  ;;  %943 = vmatprep.mubr.msk.bf16.mxu1 %vm1079_vm0, %v1078_v1 }
 0x883   :  { %941 = vmatprep.subr.bf16.mxu1 %v1078_v1 }
 0x886   :  { %942 = vmatpush3.bf16.msra.mxu1 %v1131_v2 }
 0x887   :  { %955 = vmatprep.subr.bf16.mxu1 %v1078_v1 }
 0x954   :  { %v356_v22 = vpop.f32.mrb[4].mxu1 }
 0x955   :  { %v363_v23 = vrot.slane %v356_v22, 5  ;;  %v929_v24 = vpop.f32.mrb[5].mxu1 }
 0x956   :  { %v359_v25 = vpop.f32.mrb[6].mxu1 }
 0x957   :  { %v365_v26 = vadd.f32 %v363_v23, %v1159_v9  ;;  %v930_v27 = vpop.f32.mrb[7].mxu1 }
 0x959   :  { %v859_v28 = vmul.f32 -1.442695, %v365_v26 }
 0x95b   :  { %1014 = vpow2.f32 %v859_v28 }
 0x95c   :  { %1016 = vtanh.f32 %v365_v26 }
 0x965   :  { %v1015_v29 = vpop.eup %1014 }
 0x966   :  { %v369_v31 = vadd.f32 1.0, %v1015_v29  ;;  %v1017_v32 = vpop.eup %1016 }
 0x968   :  { %1018 = vrcp.f32 %v369_v31 }
 0x972   :  { %v1019_v33 = vpop.eup %1018 }
 0x973   :  { %v373_v34 = vsel %vm53_vm1, %v1019_v33, %v1017_v32 }
 0x974   :  { %379 = vrot.lane.b32.xlu1 %v373_v34, %s1081_s1  ;;  %v377_v38 = vmul.f32 %v375_v37, %v373_v34 }
 0x9e6   :  { %v380_v35 = vpop.permute.xlu1 %379 }
 0x9e7   :  { %v382_v36 = vmul.f32 %v380_v35, %v373_v34 }
 0x9e9   :  { %384 = vrot.lane.b32.xlu0 %v382_v36, %s1081_s1 }
 0xa5b   :  { %v385_v39 = vpop.permute.xlu0 %384 }
 0xa5c   :  { %v387_v40 = vadd.f32 %v385_v39, %v377_v38 }
 0xa5e   :  { %1020 = vtanh.f32 %v387_v40  ;;  %v463_v63 = vrot.slane %v387_v40, 7 }
 0xa68   :  { %v1021_v41 = vpop.eup %1020 }
 0xa69   :  { %390 = vrot.lane.b32.xlu1 %v1021_v41, %s1081_s1 }
 0xadb   :  { %v391_v42 = vpop.permute.xlu1 %390 }
 0xadc   :  { %v1224_v43 = vmul.f32 %v391_v42, %v373_v34 }
 0xade   :  { %v400_v44 = vpack.c.bf16 %v1224_v43, %v1224_v43 }
 0xae0   :  { %v402_v45 = vshrl.u32 %v400_v44, 16 }
 0xae2   :  { %v404_v46 = vrot.slane %v402_v45, 1 }
 0xae4   :  { %405 = vrot.lane.b32.xlu0 %v404_v46, %s1082_s2 }
 0xb56   :  { %v406_v47 = vpop.permute.xlu0 %405 }
 0xb57   :  { %936 = vmatmul.mubr.msk.bf16.vlgmr.msra.gmra.mrb[8].mxu0 %vm66_vm2, %v406_v47 }
 0xb58   :  { %948 = vmatpush3.bf16.msra.mxu0 %v1123_v0  ;;  %951 = vmatprep.mubr.msk.bf16.mxu0 %vm1079_vm0, %v1078_v1 }
 0xb59   :  { %949 = vmatprep.subr.bf16.mxu0 %v1078_v1 }
 0xb5c   :  { %950 = vmatpush3.bf16.msra.mxu0 %v1131_v2 }
 0xc2a   :  { %v444_v48 = vpop.f32.mrb[8].mxu0 }
 0xc2b   :  { %v451_v49 = vrot.slane %v444_v48, 4  ;;  %v937_v50 = vpop.f32.mrb[9].mxu0 }
 0xc2c   :  { %v447_v51 = vpop.f32.mrb[10].mxu0 }
 0xc2d   :  { %v453_v52 = vadd.f32 %v451_v49, %v1159_v9  ;;  %v938_v54 = vpop.f32.mrb[11].mxu0 }
 0xc2f   :  { %v861_v55 = vmul.f32 -1.442695, %v453_v52 }
 0xc31   :  { %1022 = vpow2.f32 %v861_v55 }
 0xc32   :  { %1024 = vtanh.f32 %v453_v52 }
 0xc3b   :  { %v1023_v56 = vpop.eup %1022 }
 0xc3c   :  { %v457_v57 = vadd.f32 1.0, %v1023_v56  ;;  %v1025_v58 = vpop.eup %1024 }
 0xc3e   :  { %1026 = vrcp.f32 %v457_v57 }
 0xc48   :  { %v1027_v59 = vpop.eup %1026 }
 0xc49   :  { %v461_v60 = vsel %vm53_vm1, %v1027_v59, %v1025_v58 }
 0xc4a   :  { %467 = vrot.lane.b32.xlu1 %v461_v60, %s1081_s1  ;;  %v465_v3 = vmul.f32 %v463_v63, %v461_v60 }
 0xcbc   :  { %v468_v61 = vpop.permute.xlu1 %467 }
 0xcbd   :  { %v470_v62 = vmul.f32 %v468_v61, %v461_v60 }
 0xcbf   :  { %472 = vrot.lane.b32.xlu0 %v470_v62, %s1081_s1 }
 0xd31   :  { %v473_v4 = vpop.permute.xlu0 %472 }
 0xd32   :  { %v475_v5 = vadd.f32 %v473_v4, %v465_v3 }
 0xd34   :  { %1028 = vtanh.f32 %v475_v5  ;;  %v549_v27 = vrot.slane %v475_v5, 7 }
 0xd3e   :  { %v1029_v6 = vpop.eup %1028 }
 0xd3f   :  { %478 = vrot.lane.b32.xlu1 %v1029_v6, %s1081_s1 }
 0xdb1   :  { %v479_v7 = vpop.permute.xlu1 %478 }
 0xdb2   :  { %v1241_v8 = vmul.f32 %v479_v7, %v461_v60 }
 0xdb4   :  { %v488_v10 = vpack.c.bf16 %v1241_v8, %v1241_v8 }
 0xdb6   :  { %v490_v11 = vrot.slane %v488_v10, 2 }
 0xdb8   :  { %491 = vrot.lane.b32.xlu0 %v490_v11, %s1082_s2 }
 0xe2a   :  { %v492_v12 = vpop.permute.xlu0 %491 }
 0xe2b   :  { %944 = vmatmul.mubr.msk.bf16.vlgmr.msra.gmra.mrb[8].mxu1 %vm66_vm2, %v492_v12 }
 0xe2c   :  { %956 = vmatpush3.bf16.msra.mxu1 %v1123_v0  ;;  %959 = vmatprep.mubr.msk.bf16.mxu1 %vm1079_vm0, %v1078_v1 }
 0xe2d   :  { %957 = vmatprep.subr.bf16.mxu1 %v1078_v1 }
 0xe30   :  { %958 = vmatpush3.bf16.msra.mxu1 %v1131_v2 }
 0xefe   :  { %v530_v13 = vpop.f32.mrb[8].mxu1 }
 0xeff   :  { %v537_v14 = vrot.slane %v530_v13, 3  ;;  %v945_v15 = vpop.f32.mrb[9].mxu1 }
 0xf00   :  { %v533_v16 = vpop.f32.mrb[10].mxu1 }
 0xf01   :  { %v539_v18 = vadd.f32 %v537_v14, %v1159_v9  ;;  %v946_v20 = vpop.f32.mrb[11].mxu1 }
 0xf03   :  { %v863_v21 = vmul.f32 -1.442695, %v539_v18 }
 0xf05   :  { %1030 = vpow2.f32 %v863_v21 }
 0xf06   :  { %1032 = vtanh.f32 %v539_v18 }
 0xf0f   :  { %v1031_v22 = vpop.eup %1030 }
 0xf10   :  { %v543_v23 = vadd.f32 1.0, %v1031_v22  ;;  %v1033_v0 = vpop.eup %1032 }
 0xf12   :  { %1034 = vrcp.f32 %v543_v23 }
 0xf1c   :  { %v1035_v24 = vpop.eup %1034 }
 0xf1d   :  { %v547_v25 = vsel %vm53_vm1, %v1035_v24, %v1033_v0 }
 0xf1e   :  { %553 = vrot.lane.b32.xlu1 %v547_v25, %s1081_s1  ;;  %v551_v28 = vmul.f32 %v549_v27, %v547_v25  ;;  %v751_v27 = vld [vmem:[%s1326_s4 + $0x10] sm:$0xff] }
 0xf90   :  { %v554_v2 = vpop.permute.xlu1 %553 }
 0xf91   :  { %v556_v26 = vmul.f32 %v554_v2, %v547_v25  ;;  %v750_v2 = vld [vmem:[%s1326_s4 + $0x8] sm:$0xff] }
 0xf93   :  { %558 = vrot.lane.b32.xlu0 %v556_v26, %s1081_s1 }
0x1005   :  { %v559_v29 = vpop.permute.xlu0 %558 }
0x1006   :  { %v561_v31 = vadd.f32 %v559_v29, %v551_v28 }
0x1008   :  { %1036 = vtanh.f32 %v561_v31  ;;  %v637_v54 = vrot.slane %v561_v31, 7 }
0x1012   :  { %v1037_v32 = vpop.eup %1036 }
0x1013   :  { %564 = vrot.lane.b32.xlu1 %v1037_v32, %s1081_s1 }
0x1085   :  { %v565_v33 = vpop.permute.xlu1 %564 }
0x1086   :  { %v1258_v34 = vmul.f32 %v565_v33, %v547_v25  ;;  %v749_v25 = vld [vmem:[%s1326_s4] sm:$0xff] }
0x1087   :  { %v975_v26 = vpack.c.bf16 %v750_v2, %v749_v25 }
0x1088   :  { %v574_v35 = vpack.c.bf16 %v1258_v34, %v1258_v34 }
0x108a   :  { %v576_v36 = vshrl.u32 %v574_v35, 16 }
0x108c   :  { %v578_v37 = vrot.slane %v576_v36, 2  ;;  %v868_v36 = vld [vmem:[%s1327_s5] ss:$0 sm:$0xff] }
0x108e   :  { %579 = vrot.lane.b32.xlu0 %v578_v37, %s1082_s2 }
0x1100   :  { %v580_v38 = vpop.permute.xlu0 %579 }
0x1101   :  { %952 = vmatmul.mubr.msk.bf16.vlgmr.msra.gmra.mrb[12].mxu0 %vm66_vm2, %v580_v38 }
0x1102   :  { %971 = vmatprep.mubr.msk.f32.mxu0 %vm1079_vm0, %v1078_v1 }
0x11d4   :  { %v618_v39 = vpop.f32.mrb[12].mxu0 }
0x11d5   :  { %v625_v40 = vrot.slane %v618_v39, 2  ;;  %v953_v41 = vpop.f32.mrb[13].mxu0 }
0x11d6   :  { %v621_v42 = vpop.f32.mrb[14].mxu0 }
0x11d7   :  { %v627_v44 = vadd.f32 %v625_v40, %v1159_v9  ;;  %v954_v45 = vpop.f32.mrb[15].mxu0 }
0x11d9   :  { %v865_v46 = vmul.f32 -1.442695, %v627_v44 }
0x11db   :  { %1038 = vpow2.f32 %v865_v46 }
0x11dc   :  { %1040 = vtanh.f32 %v627_v44 }
0x11e5   :  { %v1039_v47 = vpop.eup %1038 }
0x11e6   :  { %v631_v48 = vadd.f32 1.0, %v1039_v47  ;;  %v1041_v49 = vpop.eup %1040 }
0x11e8   :  { %1042 = vrcp.f32 %v631_v48 }
0x11f2   :  { %v1043_v50 = vpop.eup %1042 }
0x11f3   :  { %v635_v51 = vsel %vm53_vm1, %v1043_v50, %v1041_v49 }
0x11f4   :  { %641 = vrot.lane.b32.xlu1 %v635_v51, %s1081_s1  ;;  %v639_v55 = vmul.f32 %v637_v54, %v635_v51 }
0x1266   :  { %v642_v1 = vpop.permute.xlu1 %641 }
0x1267   :  { %v644_v52 = vmul.f32 %v642_v1, %v635_v51 }
0x1269   :  { %646 = vrot.lane.b32.xlu0 %v644_v52, %s1081_s1 }
0x12db   :  { %v647_v56 = vpop.permute.xlu0 %646 }
0x12dc   :  { %v649_v57 = vadd.f32 %v647_v56, %v639_v55 }
0x12de   :  { %1044 = vtanh.f32 %v649_v57 }
0x12e8   :  { %v1045_v58 = vpop.eup %1044 }
0x12e9   :  { %652 = vrot.lane.b32.xlu1 %v1045_v58, %s1081_s1 }
0x135b   :  { %v653_v59 = vpop.permute.xlu1 %652 }
0x135c   :  { %v655_v60 = vmul.f32 %v653_v59, %v635_v51 }
0x135e   :  { %v662_v61 = vpack.c.bf16 %v655_v60, %v655_v60 }
0x1360   :  { %v664_v62 = vrot.slane %v662_v61, 3 }
0x1362   :  { %665 = vrot.lane.b32.xlu0 %v664_v62, %s1082_s2 }
0x13d4   :  { %v666_v63 = vpop.permute.xlu0 %665 }
0x13d5   :  { %960 = vmatmul.mubr.msk.bf16.vlgmr.msra.gmra.mrb[12].mxu1 %vm66_vm2, %v666_v63 }
0x14a8   :  { %v704_v3 = vpop.f32.mrb[12].mxu1 }
0x14a9   :  { %v711_v4 = vrot.slane %v704_v3, 1  ;;  %v961_v5 = vpop.f32.mrb[13].mxu1 }
0x14aa   :  { %v707_v6 = vpop.f32.mrb[14].mxu1 }
0x14ab   :  { %v713_v7 = vadd.f32 %v711_v4, %v1159_v9  ;;  %v962_v10 = vpop.f32.mrb[15].mxu1  ;;  %v723_v9 = vrot.slane %v649_v57, 7 }
0x14ad   :  { %v867_v11 = vmul.f32 -1.442695, %v713_v7 }
0x14af   :  { %1046 = vpow2.f32 %v867_v11 }
0x14b0   :  { %1048 = vtanh.f32 %v713_v7 }
0x14b9   :  { %v1047_v12 = vpop.eup %1046 }
0x14ba   :  { %v717_v13 = vadd.f32 1.0, %v1047_v12  ;;  %v1049_v14 = vpop.eup %1048 }
0x14bc   :  { %1050 = vrcp.f32 %v717_v13 }
0x14c6   :  { %v1051_v15 = vpop.eup %1050 }
0x14c7   :  { %v721_v16 = vsel %vm53_vm1, %v1051_v15, %v1049_v14 }
0x14c8   :  { %727 = vrot.lane.b32.xlu1 %v721_v16, %s1081_s1  ;;  %v725_v19 = vmul.f32 %v723_v9, %v721_v16 }
0x153a   :  { %v728_v18 = vpop.permute.xlu1 %727 }
0x153b   :  { %v730_v20 = vmul.f32 %v728_v18, %v721_v16 }
0x153d   :  { %732 = vrot.lane.b32.xlu0 %v730_v20, %s1081_s1 }
0x1541   :  { %137 = vrot.lane.b32.xlu0 %v1170_v30, %s1082_s2 }
0x1545   :  { %309 = vrot.lane.b32.xlu0 %v1206_v17, %s1082_s2  ;;  %v1083_v17 = vmov 0.0|0.0  }
0x1546   :  { %974 = vmatprep.subr.bf16.mxu0 %v1083_v17 }
0x1547   :  { %976 = vmatpush3.bf16.msra.mxu0 %v975_v26 }
0x1548   :  { %977 = vmatprep.subr.bf16.mxu0 %v1083_v17 }
0x1549   :  { %483 = vrot.lane.b32.xlu0 %v1241_v8, %s1082_s2 }
0x154d   :  { %657 = vrot.lane.b32.xlu0 %v655_v60, %s1082_s2 }
0x15af   :  { %v733_v21 = vpop.permute.xlu0 %732 }
0x15b0   :  { %v735_v22 = vadd.f32 %v733_v21, %v725_v19 }
0x15b2   :  { %1052 = vtanh.f32 %v735_v22 }
0x15b3   :  { %v138_v23 = vpop.permute.xlu0 %137 }
0x15b4   :  { %141 = vst.msk [vmem:[#allocation2] sm:$0x1] %vm140_vm3, %v138_v23 }
0x15b7   :  { %v310_v0 = vpop.permute.xlu0 %309 }
0x15b8   :  { %313 = vst.msk [vmem:[#allocation2] sm:$0x4] %vm312_vm4, %v310_v0 }
0x15bb   :  { %v484_v30 = vpop.permute.xlu0 %483 }
0x15bc   :  { %v1053_v24 = vpop.eup %1052  ;;  %487 = vst.msk [vmem:[#allocation2] sm:$0x10] %vm486_vm5, %v484_v30 }
0x15bd   :  { %738 = vrot.lane.b32.xlu1 %v1053_v24, %s1081_s1 }
0x15bf   :  { %v658_v8 = vpop.permute.xlu0 %657 }
0x15c0   :  { %661 = vst.msk [vmem:[#allocation2] sm:$0x40] %vm660_vm6, %v658_v8 }
0x15c1   :  { %222 = vrot.lane.b32.xlu1 %v1188_v53, %s1082_s2  ;;  %v752_v53 = vld [vmem:[%s1326_s4 + $0x18] sm:$0xff] }
0x15c5   :  { %395 = vrot.lane.b32.xlu1 %v1224_v43, %s1082_s2  ;;  %v978_v43 = vpack.c.bf16 %v752_v53, %v751_v27 }
0x15c7   :  { %979 = vmatpush3.bf16.msra.mxu0 %v978_v43 }
0x15c9   :  { %569 = vrot.lane.b32.xlu1 %v1258_v34, %s1082_s2 }
0x162f   :  { %v739_v28 = vpop.permute.xlu1 %738 }
0x1630   :  { %v741_v29 = vmul.f32 %v739_v28, %v721_v16 }
0x1632   :  { %743 = vrot.lane.b32.xlu1 %v741_v29, %s1082_s2 }
0x1633   :  { %v223_v31 = vpop.permute.xlu1 %222 }
0x1634   :  { %226 = vst.msk [vmem:[#allocation2] sm:$0x2] %vm225_vm7, %v223_v31 }
0x1637   :  { %v396_v32 = vpop.permute.xlu1 %395 }
0x1638   :  { %399 = vst.msk [vmem:[#allocation2] sm:$0x8] %vm398_vm8, %v396_v32 }
0x163b   :  { %v570_v33 = vpop.permute.xlu1 %569 }
0x163c   :  { %573 = vst.msk [vmem:[#allocation2] sm:$0x20] %vm572_vm9, %v570_v33 }
0x16a4   :  { %v744_v34 = vpop.permute.xlu1 %743 }
0x16a5   :  { %747 = vst.msk [vmem:[#allocation2] sm:$0x80] %vm746_vm10, %v744_v34 }
0x16ac   :  { %v748_v35 = vld [vmem:[#allocation2] sm:$0xff] }
0x16ad   :  { %972 = vmatmul.mubr.msk.f32.vlgmr.msra.gmra.mrb[16].mxu0 %vm66_vm2, %v748_v35 }
0x1780   :  { %v829_v37 = vpop.f32.mrb[16].mxu0 }
0x1781   :  { %v830_v38 = vadd.f32 %v868_v36, %v829_v37  ;;  %v973_v39 = vpop.f32.mrb[17].mxu0 }
0x1783   :  { %834 = vst.msk [vmem:[#allocation3] sm:$0xff] %vm833_vm11, %v830_v38 }
0x1784   :  { %1065 = shalt.err (!%p1062_p4)
}
0x1785   :  { %s1066_s19 = scalar_lea.hbm %s1328_s6, 128 }
0x1786   :  { %p1067_p5 = scmp.ne.s32.totalorder %s1328_s6, %s1066_s19  ;;  %p1070_p6 = scmp.lt.u32.totalorder %s1066_s19, %s1328_s6 }
0x1788   :  { %p1072_p7 = pnand %p1070_p6, %p1067_p5 }
0x178a   :  { %1075 = shalt.err (!%p1072_p7)
}
0x178b   :  { %844 = dma.vmem_to_hbm [thread:$0]  %s842_s15, 128, %s1328_s6, [#allocation4]  }
0x178c   :  { %1076 = dma.done.wait [#allocation4], 128  }
0x178d   :  { %1077 = vsyncadd [#allocation4], 4294967168 }
0x178e   :  { %848 = vsyncpa [#allocation4], 1 }

</bundles_post_ra>
